<compile_context>
chip_gen: v7x
topology: tpu7x:2x2x1
jax: 0.10.0
libtpu: 0.0.40
codegen_flags: <defaults>
</compile_context>

<pallas_src>
import numpy as np
import jax
import jax.numpy as jnp
from jax.experimental import pallas as pl
from jax.experimental.pallas import tpu as pltpu


def _separable_taps(filter_size: int = 5) -> np.ndarray:
    """1-D taps t with outer(t, t) == the module's normalized Hanning filter."""
    a = np.hanning(filter_size)[1:-1]              # length filter_size - 2
    return (a / a.sum()).astype(np.float64)


def _vmem_capacity_bytes() -> int:
    """Physical VMEM of the current chip (conservative fallback = v7x 64 MiB)."""
    try:
        return int(pltpu.get_tpu_info().vmem_capacity_bytes)
    except Exception:
        return 64 << 20


def make_l2pool_kernel(H: int, W: int, taps):
    K = len(taps)
    mid = K // 2                       # number of neighbor shifts per side (== pad)
    taps = [float(t) for t in taps]

    def conv1d_same(v, axis, size):
        """Symmetric 'same' zero-padded 1-D conv along a minor (lane/sublane)
        axis, entirely in registers: XLU rolls + VPU selects, no ref round trip."""
        acc = taps[mid] * v
        if mid == 0:
            return acc
        idx = jax.lax.broadcasted_iota(jnp.int32, v.shape, axis)
        for s in range(1, mid + 1):
            t = taps[mid - s]                              # == taps[mid + s] (symmetric)
            prev = pltpu.roll(v, s % size, axis)           # v[i - s] (wraps at i < s)
            prev = jnp.where(idx >= s, prev, 0.0)          # zero halo on the left
            nxt = pltpu.roll(v, (size - s) % size, axis)   # v[i + s] (wraps at i >= size-s)
            nxt = jnp.where(idx < size - s, nxt, 0.0)      # zero halo on the right
            acc = acc + t * (prev + nxt)                   # shared tap: 1 mul per pair
        return acc

    def kernel(x_ref, o_ref):
        # x_ref / o_ref : (TC, H, W) block in native NCHW-derived layout.
        x = x_ref[...].astype(jnp.float32)
        xsq = x * x                                        # input ** 2
        h = conv1d_same(xsq, 2, W)                         # W (lane) pass
        acc = conv1d_same(h, 1, H)                         # H (sublane) pass
        o_ref[...] = jnp.sqrt(acc + 1e-12).astype(o_ref.dtype)

    return kernel


def _choose_channel_tile(NC: int, H: int, W: int,
                         elem_bytes: int, target_block_bytes: int) -> int:
    """Leading-dim channel tile: a divisor of NC sized to the per-chip block
    budget, preferring an EVEN number of grid steps (v7x: two TensorCores split
    the 'parallel' grid) and otherwise the largest block within budget."""
    slice_bytes = H * W * elem_bytes
    max_tc = max(1, target_block_bytes // slice_bytes)
    cands = [d for d in range(1, NC + 1) if NC % d == 0 and d <= max_tc]
    if not cands:
        # TODO(synk): a single (1, H, W) slice already exceeds the budget; an
        # H-tiling grid axis with a pad-row halo would be needed for such shapes.
        cands = [1]
    even = [d for d in cands if (NC // d) % 2 == 0]
    pool = even if even else cands
    return max(pool)


def l2pooling(x: jnp.ndarray, filter_size: int = 5, stride: int = 1) -> jnp.ndarray:
    """x: (N, C, H, W) NCHW. Matches the PyTorch module's forward (default stride=1)."""
    N, C, H, W = x.shape
    taps = _separable_taps(filter_size)
    K = len(taps)
    pad = (filter_size - 2) // 2
    assert K == 2 * pad + 1, "odd filter_size ('same'-style padding) expected"
    assert np.allclose(taps, taps[::-1]), "symmetric (Hanning) taps expected"

    NC = N * C
    xr = x.reshape(NC, H, W)          # free reshape -- native layout, no transpose

    vmem_cap = _vmem_capacity_bytes()
    # ~6 MiB blocks on 128 MiB chips (v5e/v6e), ~3 MiB on v7x's 64 MiB; leaves
    # room for double-buffered I/O and the in-register stencil intermediates.
    target_block = max(1 << 20, min(vmem_cap // 20, 8 << 20))
    TC = _choose_channel_tile(NC, H, W, 4, target_block)
    grid = (NC // TC,)

    kernel = make_l2pool_kernel(H, W, taps)

    out = pl.pallas_call(
        kernel,
        out_shape=jax.ShapeDtypeStruct((NC, H, W), x.dtype),
        grid_spec=pltpu.PrefetchScalarGridSpec(
            num_scalar_prefetch=0,
            grid=grid,
            in_specs=[pl.BlockSpec((TC, H, W), lambda c: (c, 0, 0))],
            out_specs=pl.BlockSpec((TC, H, W), lambda c: (c, 0, 0)),
        ),
        compiler_params=pltpu.CompilerParams(
            dimension_semantics=("parallel",),
            vmem_limit_bytes=int(min(vmem_cap * 3 // 4, 96 << 20)),
        ),
    )(xr)

    y = out.reshape(N, C, H, W)
    if stride != 1:
        # stride-s conv output == stride-1 'same' output subsampled every s.
        # TODO(synk): compute only the strided rows/cols in-kernel (or via the
        # output BlockSpec) to avoid stride^2 x extra HBM writeback.
        y = y[:, :, ::stride, ::stride]
    return y


def l2pooling_ref(x: jnp.ndarray, filter_size: int = 5, stride: int = 1) -> jnp.ndarray:
    """Pure-JAX reference (lax.conv) mirroring F.conv2d groups=C semantics."""
    N, C, H, W = x.shape
    a = np.hanning(filter_size)[1:-1]
    g = a[:, None] * a[None, :]
    g = (g / g.sum()).astype(np.float32)
    pad = (filter_size - 2) // 2
    w = jnp.broadcast_to(jnp.asarray(g)[None, None], (C, 1, g.shape[0], g.shape[1]))
    out = jax.lax.conv_general_dilated(
        (x.astype(jnp.float32)) ** 2, w.astype(jnp.float32),
        window_strides=(stride, stride), padding=[(pad, pad), (pad, pad)],
        feature_group_count=C,
        dimension_numbers=("NCHW", "OIHW", "NCHW"),
    )
    return jnp.sqrt(out + 1e-12).astype(x.dtype)


if __name__ == "__main__":
    key = jax.random.PRNGKey(0)
    N, C, H, W = 2, 4, 16, 16
    x = jax.random.normal(key, (N, C, H, W), dtype=jnp.float32)

    # default (stride=1) path — the module's forward
    y = jax.block_until_ready(l2pooling(x))
    y_ref = jax.block_until_ready(l2pooling_ref(x))
    assert y.shape == (N, C, H, W)
    np.testing.assert_allclose(np.asarray(y), np.asarray(y_ref), rtol=1e-5, atol=1e-5)

    # strided variant (some L2pooling deployments use stride=2)
    y2 = jax.block_until_ready(l2pooling(x, stride=2))
    y2_ref = jax.block_until_ready(l2pooling_ref(x, stride=2))
    assert y2.shape == y2_ref.shape
    np.testing.assert_allclose(np.asarray(y2), np.asarray(y2_ref), rtol=1e-5, atol=1e-5)

    print("KERNEL_OK")
</pallas_src>

<mosaic_0001>
module attributes {stable_mosaic.version = 11 : i64} {
  func.func @kernel(%arg0: i32, %arg1: memref<4x16x16xf32, #tpu.memory_space<vmem>>, %arg2: memref<4x16x16xf32, #tpu.memory_space<vmem>>) attributes {dimension_semantics = [#tpu.dimension_semantics<parallel>], iteration_bounds = array<i64: 2>, scalar_prefetch = 0 : i64, scratch_operands = 0 : i64, tpu.core_type = #tpu.core_type<tc>, window_params = [{transform_indices = @transform_0, window_bounds = array<i64: 4, 16, 16>}, {transform_indices = @transform_1, window_bounds = array<i64: 4, 16, 16>}]} {
    %c0 = arith.constant 0 : index
    %c0_0 = arith.constant 0 : index
    %c0_1 = arith.constant 0 : index
    %0 = vector.load %arg1[%c0, %c0_0, %c0_1] : memref<4x16x16xf32, #tpu.memory_space<vmem>>, vector<4x16x16xf32>
    %1 = arith.mulf %0, %0 : vector<4x16x16xf32>
    %cst = arith.constant 5.000000e-01 : f32
    %2 = vector.broadcast %cst : f32 to vector<4x16x16xf32>
    %3 = arith.mulf %2, %1 : vector<4x16x16xf32>
    %4 = tpu.iota {dimensions = array<i32: 2>} : vector<4x16x16xi32>
    %c1_i32 = arith.constant 1 : i32
    %5 = tpu.dynamic_rotate %1 by %c1_i32 dim 2 : vector<4x16x16xf32>, i32 -> vector<4x16x16xf32>
    %c1_i32_2 = arith.constant 1 : i32
    %6 = vector.broadcast %c1_i32_2 : i32 to vector<4x16x16xi32>
    %7 = arith.cmpi sge, %4, %6 : vector<4x16x16xi32>
    %cst_3 = arith.constant 0.000000e+00 : f32
    %8 = vector.broadcast %cst_3 : f32 to vector<4x16x16xf32>
    %9 = arith.select %7, %5, %8 : vector<4x16x16xi1>, vector<4x16x16xf32>
    %c15_i32 = arith.constant 15 : i32
    %10 = tpu.dynamic_rotate %1 by %c15_i32 dim 2 : vector<4x16x16xf32>, i32 -> vector<4x16x16xf32>
    %c15_i32_4 = arith.constant 15 : i32
    %11 = vector.broadcast %c15_i32_4 : i32 to vector<4x16x16xi32>
    %12 = arith.cmpi slt, %4, %11 : vector<4x16x16xi32>
    %cst_5 = arith.constant 0.000000e+00 : f32
    %13 = vector.broadcast %cst_5 : f32 to vector<4x16x16xf32>
    %14 = arith.select %12, %10, %13 : vector<4x16x16xi1>, vector<4x16x16xf32>
    %15 = arith.addf %9, %14 : vector<4x16x16xf32>
    %cst_6 = arith.constant 2.500000e-01 : f32
    %16 = vector.broadcast %cst_6 : f32 to vector<4x16x16xf32>
    %17 = arith.mulf %16, %15 : vector<4x16x16xf32>
    %18 = arith.addf %3, %17 : vector<4x16x16xf32>
    %cst_7 = arith.constant 5.000000e-01 : f32
    %19 = vector.broadcast %cst_7 : f32 to vector<4x16x16xf32>
    %20 = arith.mulf %19, %18 : vector<4x16x16xf32>
    %21 = tpu.iota {dimensions = array<i32: 1>} : vector<4x16x16xi32>
    %c1_i32_8 = arith.constant 1 : i32
    %22 = tpu.dynamic_rotate %18 by %c1_i32_8 dim 1 : vector<4x16x16xf32>, i32 -> vector<4x16x16xf32>
    %c1_i32_9 = arith.constant 1 : i32
    %23 = vector.broadcast %c1_i32_9 : i32 to vector<4x16x16xi32>
    %24 = arith.cmpi sge, %21, %23 : vector<4x16x16xi32>
    %cst_10 = arith.constant 0.000000e+00 : f32
    %25 = vector.broadcast %cst_10 : f32 to vector<4x16x16xf32>
    %26 = arith.select %24, %22, %25 : vector<4x16x16xi1>, vector<4x16x16xf32>
    %c15_i32_11 = arith.constant 15 : i32
    %27 = tpu.dynamic_rotate %18 by %c15_i32_11 dim 1 : vector<4x16x16xf32>, i32 -> vector<4x16x16xf32>
    %c15_i32_12 = arith.constant 15 : i32
    %28 = vector.broadcast %c15_i32_12 : i32 to vector<4x16x16xi32>
    %29 = arith.cmpi slt, %21, %28 : vector<4x16x16xi32>
    %cst_13 = arith.constant 0.000000e+00 : f32
    %30 = vector.broadcast %cst_13 : f32 to vector<4x16x16xf32>
    %31 = arith.select %29, %27, %30 : vector<4x16x16xi1>, vector<4x16x16xf32>
    %32 = arith.addf %26, %31 : vector<4x16x16xf32>
    %cst_14 = arith.constant 2.500000e-01 : f32
    %33 = vector.broadcast %cst_14 : f32 to vector<4x16x16xf32>
    %34 = arith.mulf %33, %32 : vector<4x16x16xf32>
    %35 = arith.addf %20, %34 : vector<4x16x16xf32>
    %cst_15 = arith.constant 9.99999996E-13 : f32
    %36 = vector.broadcast %cst_15 : f32 to vector<4x16x16xf32>
    %37 = arith.addf %35, %36 : vector<4x16x16xf32>
    %38 = math.sqrt %37 : vector<4x16x16xf32>
    %c0_16 = arith.constant 0 : index
    %c0_17 = arith.constant 0 : index
    %c0_18 = arith.constant 0 : index
    %39 = vector.load %arg2[%c0_16, %c0_17, %c0_18] : memref<4x16x16xf32, #tpu.memory_space<vmem>>, vector<4x16x16xf32>
    tpu.vector_store %arg2[%c0_16, %c0_17, %c0_18], %38 {strides = array<i32>} : memref<4x16x16xf32, #tpu.memory_space<vmem>>, vector<4x16x16xf32>,
    return
  }
  func.func @transform_0(%arg0: i32) -> (i32, i32, i32) {
    %c0_i32 = arith.constant 0 : i32
    %c0_i32_0 = arith.constant 0 : i32
    %c0_i32_1 = arith.constant 0 : i32
    return %arg0, %c0_i32, %c0_i32_0 : i32, i32, i32
  }
  func.func @transform_1(%arg0: i32) -> (i32, i32, i32) {
    %c0_i32 = arith.constant 0 : i32
    %c0_i32_0 = arith.constant 0 : i32
    %c0_i32_1 = arith.constant 0 : i32
    return %arg0, %c0_i32, %c0_i32_0 : i32, i32, i32
  }
}

</mosaic_0001>

<bundles_post_ra>
// kernel: tpu_custom_call.1
= control target key start
LH: loop header
LB: loop body
LE: loop exit
PB: predicated region body
PF: predicated region fallthrough
CT: control target
= control target key end

     0   :  { %6 = vsyncpa [#allocation3], 0  ;;  %s1173_s0 = inlined_call_operand.hbm [shape: f32[8,16,16], index: 0, kind: input, shape index: {}]   ;;  %s1174_s1 = inlined_call_operand.hbm [shape: f32[8,16,16], index: 1, kind: output, shape index: {}]  }
   0x1   :  { %8 = vsyncpa [#allocation3 + $0x1], 0 }
   0x2   :  { %9 = vsyncpa [#allocation4], 0 }
   0x3   :  { %11 = vsyncpa [#allocation4 + $0x1], 0  ;;  %s767_s6 = smov 0   ;;  %s769_s7 = smov 0  }
   0x4   :  { %s771_s8 = smov 0   ;;  %s773_s9 = smov 0  }
   0x5 LB: > { %s788_s10 = sadd.s32 4294967295, %s746_s9   ;;  %s561_s11 = sadd.s32 4294967294, %s746_s9   ;;  %s746_s9 = sphi %s773_s9, %s1187_s9   ;;  %s742_s8 = sphi %s771_s8, %s1186_s8   ;;  %s738_s7 = sphi %s769_s7, %s1185_s7   ;;  %s734_s6 = sphi %s767_s6, %s1184_s6  }
   0x6   : > { %s792_s12 = sadd.s32 1, %s746_s9   ;;  %s24_s13 = sadd.s32 1, %s742_s8 }
   0x7   : > { %s21_s14 = ssub.s32 %s746_s9, %s792_s12  ;;  %p31_p0 = scmp.ne.s32.totalorder %s742_s8, %s738_s7 }
   0x8   : > { %p22_p1 = scmp.eq.s32.totalorder %s21_s14, 0  ;;  %p32_p2 = scmp.eq.s32.totalorder %s746_s9, 0 }
   0x9   : > { %p37_p3 = scmp.ne.s32.totalorder %s738_s7, %s734_s6  ;;  %p38_p4 = scmp.eq.s32.totalorder %s788_s10, 0 }
   0xa   : > { %s804_s15 = scalar_select %p22_p1, %s742_s8, %s24_s13  }
   0xb   : > { %p806_p5 = por %p32_p2, %p31_p0  ;;  %p810_p6 = por %p38_p4, %p37_p3 }
   0xc   : > { %p61_p7 = scmp.eq.s32.totalorder %s788_s10, 1  ;;  %p67_p8 = scmp.eq.s32.totalorder %s561_s11, 1 }
   0xd   : > { %p593_p10 = scmp.lt.s32.totalorder %s746_s9, 2  ;;  %s87_s20 = sand.u32 1, %s742_s8  }
   0xe   : > { %p817_p11 = por %p61_p7, %p31_p0  ;;  %p821_p12 = por %p67_p8, %p37_p3 }
   0xf   : > { %s578_s21 = sshll.u32 %s746_s9, 10  ;;  %s564_s22 = sshll.u32 %s87_s20, 6 }
  0x10   : > { %s1178_s18 = scalar_select %p817_p11, 1, 0 }
  0x11   : > { %s1179_s19 = scalar_select %p821_p12, 1, 0 }
  0x12   : > { %s830_s25 = scalar_lea.hbm %s1173_s0, %s578_s21  ;;  %s91_s26 = scalar_lea.vmem [#allocation2], %s564_s22 }
  0x13   : > { %s99_s27 = sshll.u32 %s91_s26, 4  ;;  %p834_p13 = pnand %p593_p10, %p806_p5  ;;  %s838_s27 = int_to_ptr.vmem [resolvable:$true] %s99_s27 }
  0x14   : > { %s840_s29 = scalar_lea.sflag [#allocation3], %s87_s20  ;;  %s650_s30 = scalar_lea.hbm %s830_s25, 1024 }
  0x15   : > { %p651_p0 = scmp.ne.s32.totalorder %s830_s25, %s650_s30  ;;  %p652_p1 = pneg %p834_p13 }
  0x16   : > { %s655_s4 = scalar_lea.hbm %s1173_s0, 2048  ;;  %p656_p4 = scmp.lt.u32.totalorder %s830_s25, %s1173_s0 }
  0x17   : > { %p653_p2 = pnand %p652_p1, %p651_p0  ;;  %p657_p5 = scmp.lt.u32.totalorder %s655_s4, %s650_s30 }
  0x18   : > { %p659_p8 = scmp.lt.u32.totalorder %s650_s30, %s830_s25 }
  0x19   : > { %p654_p3 = pneg %p653_p2  ;;  %p658_p7 = por %p657_p5, %p656_p4 }
  0x1b   : > { %p660_p10 = por %p659_p8, %p658_p7 }
  0x1d   : > { %p661_p9 = pnand %p660_p10, %p654_p3 }
  0x1f   : > { %664 = shalt.err (!%p661_p9)
}
  0x20   : > { %s665_s13 = scalar_lea.vmem %s838_s27, 1024  ;;  %s748_s14 = smov [#allocation2]  }
  0x21   : > { %p666_p0 = scmp.ne.s32.totalorder %s838_s27, %s665_s13  ;;  %s670_s16 = sshll.u32 %s748_s14, 4  ;;  %s671_s16 = int_to_ptr.vmem [resolvable:$false] %s670_s16 }
  0x22   : > { %s672_s20 = scalar_lea.vmem %s671_s16, 2048  ;;  %p673_p11 = scmp.lt.s32.totalorder %s838_s27, %s671_s16 }
  0x23   : > { %p668_p2 = pnand %p666_p0, %p652_p1  ;;  %p674_p4 = scmp.lt.s32.totalorder %s672_s20, %s665_s13 }
  0x25   : > { %p669_p12 = pneg %p668_p2  ;;  %p675_p5 = por %p674_p4, %p673_p11 }
  0x27   : > { %p676_p7 = pnand %p675_p5, %p669_p12 }
  0x29   : > { %679 = shalt.err (!%p676_p7)
}
  0x2a   : > { %s749_s21 = smov 128   ;;  %s750_s22 = smov 8  }
  0x2b   : > { %588 = dma.hbm_to_vmem [thread:$0]  (!%p834_p13), %s830_s25, 1024, %s838_s27, %s840_s29, %s749_s21, %s749_s21, %s750_s22  }
  0x2c   : > { %p568_p9 = scmp.ge.s32.totalorder %s746_s9, 1  ;;  %p107_p1 = scmp.lt.s32.totalorder %s746_s9, 3 }
  0x2e   : > { %p108_p3 = pnand %p568_p9, %p107_p1 }
  0x2f   : > { %s871_s23 = sand.u32 (!%p108_p3), 1, %s738_s7  }
  0x30   : > { %111 = sbr.rel (%p108_p3) target bundleno = 499 (0x1f3), region = 24  ;;  %s569_s24 = sshll.u32 (!%p108_p3), %s871_s23, 6 }
  0x31   : > { %s114_s26 = scalar_lea.sflag (!%p108_p3), [#allocation3], %s871_s23  ;;  %s117_s30 = scalar_lea.vmem (!%p108_p3), [#allocation2], %s569_s24 }
  0x37   : > { %725 = dma.done.wait (%p810_p6), %s114_s26, 1024  }
  0x38   : > { %727 = vsyncadd (%p810_p6), %s114_s26, 4294966272  ;;  %v138_v0 = vld [vmem:[%s117_s30] sm:$0xff]  ;;  %v140_v1 = vld [vmem:[%s117_s30 + $0x10] sm:$0xff]  ;;  %s751_s25 = smov 16   ;;  %vm164_vm0 = vcmask 1047680   ;;  %s752_s17 = smov 113   ;;  %v162_v51 = vlaneseq }
  0x39   : > { %v139_v2 = vld [vmem:[%s117_s30 + $0x8] sm:$0xff]  ;;  %v881_v3 = vmul.f32 %v138_v0, %v138_v0  ;;  %v883_v4 = vmul.f32 %v140_v1, %v140_v1  ;;  %v141_v5 = vld [vmem:[%s117_s30 + $0x18] sm:$0xff]  ;;  %v142_v8 = vld [vmem:[%s117_s30 + $0x20] sm:$0xff]  ;;  %s753_s27 = smov 127   ;;  %vm464_vm7 = vcmask 130048   ;;  %s1080_s28 = scalar_lea.vmem [#allocation5], %s569_s24 }
  0x3a   : > { %v889_v6 = vmul.f32 %v139_v2, %v139_v2  ;;  %v891_v7 = vmul.f32 %v141_v5, %v141_v5  ;;  %v143_v9 = vld [vmem:[%s117_s30 + $0x28] sm:$0xff]  ;;  %v897_v10 = vmul.f32 %v142_v8, %v142_v8  ;;  %v144_v12 = vld [vmem:[%s117_s30 + $0x30] sm:$0xff]  ;;  %v145_v13 = vld [vmem:[%s117_s30 + $0x38] sm:$0xff]  ;;  %v953_v54 = vand.u32 127, %v162_v51  ;;  %s580_s29 = sshll.u32 %s788_s10, 10  ;;  %s488_s2 = sshll.u32 %s1080_s28, 4  ;;  %s1125_s2 = int_to_ptr.vmem [resolvable:$true] %s488_s2 }
  0x3b   : > { %165 = vrot.lane.b32.xlu0 %v881_v3, %s751_s25  ;;  %171 = vrot.lane.b32.xlu1 %v883_v4, %s751_s25  ;;  %v899_v11 = vmul.f32 %v143_v9, %v143_v9  ;;  %v905_v14 = vmul.f32 %v144_v12, %v144_v12  ;;  %v907_v15 = vmul.f32 %v145_v13, %v145_v13  ;;  %v965_v62 = vshrl.u32 %v162_v51, 7  ;;  %s1123_s5 = scalar_lea.hbm %s1174_s1, %s580_s29  ;;  %s474_s10 = scalar_lea.sflag [#allocation4], %s871_s23 }
  0x3c   : > { %vm213_vm1 = vcmp.ge.s32.totalorder %v953_v54, 1  ;;  %vm254_vm2 = vcmp.lt.s32.totalorder %v953_v54, 15  ;;  %v154_v63 = vmul.f32 0.5, %v881_v3  ;;  %v155_v13 = vmul.f32 0.5, %v889_v6  ;;  %s680_s11 = scalar_lea.vmem %s1125_s2, 1024  ;;  %p1181_p11 = scmp.ne.s32.totalorder %s1178_s18, 0 }
  0x3d   : > { %vm330_vm3 = vcmp.lt.s32.totalorder %v965_v62, 1  ;;  %vm339_vm4 = vcmp.ge.s32.totalorder %v965_v62, 1  ;;  %vm357_vm5 = vcmp.lt.s32.totalorder %v965_v62, 7  ;;  %p681_p6 = scmp.ne.s32.totalorder %s1125_s2, %s680_s11  ;;  %s754_s13 = smov [#allocation5]  }
  0x3e   : > { %s684_s14 = sshll.u32 %s754_s13, 4  ;;  %s685_s14 = int_to_ptr.vmem [resolvable:$false] %s684_s14 }
  0x3f   : > { %168 = vrot.lane.b32.xlu0 %v889_v6, %s751_s25  ;;  %174 = vrot.lane.b32.xlu1 %v891_v7, %s751_s25  ;;  %p682_p12 = pnand %p681_p6, %p1181_p11  ;;  %s686_s16 = scalar_lea.vmem %s685_s14, 2048 }
  0x40   : > { %p687_p8 = scmp.lt.s32.totalorder %s1125_s2, %s685_s14  ;;  %p688_p10 = scmp.lt.s32.totalorder %s686_s16, %s680_s11 }
  0x41   : > { %p683_p13 = pneg %p682_p12 }
  0x42   : > { %p689_p0 = por %p688_p10, %p687_p8 }
  0x43   : > { %177 = vrot.lane.b32.xlu0 %v897_v10, %s751_s25  ;;  %180 = vrot.lane.b32.xlu1 %v899_v11, %s751_s25 }
  0x44   : > { %p690_p2 = pnand %p689_p0, %p683_p13 }
  0x47   : > { %183 = vrot.lane.b32.xlu0 %v905_v14, %s751_s25  ;;  %186 = vrot.lane.b32.xlu1 %v907_v15, %s751_s25 }
  0xad   : > { %v166_v16 = vpop.permute.xlu0 %165  ;;  %v172_v17 = vpop.permute.xlu1 %171 }
  0xae   : > { %v167_v18 = vsel %vm164_vm0, %v166_v16, %v881_v3  ;;  %v173_v19 = vsel %vm164_vm0, %v172_v17, %v883_v4 }
  0xaf   : > { %189 = vrot.lane.b32.xlu0 %v167_v18, %s751_s25  ;;  %v978_v18 = vadd.s32 8, %v965_v62 }
  0xb1   : > { %v169_v20 = vpop.permute.xlu0 %168  ;;  %v175_v21 = vpop.permute.xlu1 %174  ;;  %vm367_vm6 = vcmp.lt.s32.totalorder %v978_v18, 15 }
  0xb2   : > { %v170_v22 = vsel %vm164_vm0, %v169_v20, %v889_v6  ;;  %v176_v23 = vsel %vm164_vm0, %v175_v21, %v891_v7 }
  0xb3   : > { %193 = vrot.lane.b32.xlu0 %v173_v19, %s751_s25  ;;  %191 = vrot.lane.b32.xlu1 %v170_v22, %s751_s25  ;;  %v156_v22 = vmul.f32 0.5, %v883_v4 }
  0xb5   : > { %v178_v24 = vpop.permute.xlu0 %177  ;;  %v181_v25 = vpop.permute.xlu1 %180 }
  0xb6   : > { %v179_v26 = vsel %vm164_vm0, %v178_v24, %v897_v10  ;;  %v182_v27 = vsel %vm164_vm0, %v181_v25, %v899_v11 }
  0xb7   : > { %195 = vrot.lane.b32.xlu1 %v176_v23, %s751_s25  ;;  %197 = vrot.lane.b32.xlu0 %v179_v26, %s751_s25 }
  0xb9   : > { %v184_v28 = vpop.permute.xlu0 %183  ;;  %v187_v29 = vpop.permute.xlu1 %186 }
  0xba   : > { %v185_v30 = vsel %vm164_vm0, %v184_v28, %v905_v14  ;;  %v188_v31 = vsel %vm164_vm0, %v187_v29, %v907_v15  ;;  %v157_v28 = vmul.f32 0.5, %v891_v7  ;;  %v158_v29 = vmul.f32 0.5, %v897_v10 }
  0xbb   : > { %199 = vrot.lane.b32.xlu1 %v182_v27, %s751_s25  ;;  %201 = vrot.lane.b32.xlu0 %v185_v30, %s751_s25 }
  0xbf   : > { %203 = vrot.lane.b32.xlu1 %v188_v31, %s751_s25 }
 0x121   : > { %v190_v32 = vpop.permute.xlu0 %189 }
 0x122   : > { %v205_v33 = vsel %vm164_vm0, %v190_v32, %v881_v3 }
 0x123   : > { %222 = vrot.lane.b32.xlu0 %v205_v33, %s752_s17 }
 0x125   : > { %v192_v34 = vpop.permute.xlu1 %191  ;;  %v194_v35 = vpop.permute.xlu0 %193 }
 0x126   : > { %v206_v36 = vsel %vm164_vm0, %v192_v34, %v889_v6  ;;  %v207_v37 = vsel %vm164_vm0, %v194_v35, %v883_v4 }
 0x127   : > { %224 = vrot.lane.b32.xlu1 %v206_v36, %s752_s17  ;;  %226 = vrot.lane.b32.xlu0 %v207_v37, %s752_s17 }
 0x129   : > { %v196_v38 = vpop.permute.xlu1 %195  ;;  %v198_v39 = vpop.permute.xlu0 %197 }
 0x12a   : > { %v208_v40 = vsel %vm164_vm0, %v196_v38, %v891_v7  ;;  %v209_v41 = vsel %vm164_vm0, %v198_v39, %v897_v10 }
 0x12b   : > { %228 = vrot.lane.b32.xlu1 %v208_v40, %s752_s17  ;;  %230 = vrot.lane.b32.xlu0 %v209_v41, %s752_s17 }
 0x12d   : > { %v200_v42 = vpop.permute.xlu1 %199  ;;  %v202_v43 = vpop.permute.xlu0 %201 }
 0x12e   : > { %v210_v44 = vsel %vm164_vm0, %v200_v42, %v899_v11  ;;  %v211_v45 = vsel %vm164_vm0, %v202_v43, %v905_v14 }
 0x12f   : > { %232 = vrot.lane.b32.xlu1 %v210_v44, %s752_s17  ;;  %234 = vrot.lane.b32.xlu0 %v211_v45, %s752_s17 }
 0x131   : > { %v204_v46 = vpop.permute.xlu1 %203 }
 0x132   : > { %v212_v47 = vsel %vm164_vm0, %v204_v46, %v907_v15 }
 0x133   : > { %236 = vrot.lane.b32.xlu1 %v212_v47, %s752_s17  ;;  %255 = vrot.lane.b32.xlu0 %v205_v33, %s753_s27 }
 0x137   : > { %257 = vrot.lane.b32.xlu1 %v206_v36, %s753_s27  ;;  %259 = vrot.lane.b32.xlu0 %v207_v37, %s753_s27 }
 0x13b   : > { %261 = vrot.lane.b32.xlu1 %v208_v40, %s753_s27  ;;  %263 = vrot.lane.b32.xlu0 %v209_v41, %s753_s27 }
 0x13f   : > { %265 = vrot.lane.b32.xlu1 %v210_v44, %s753_s27  ;;  %267 = vrot.lane.b32.xlu0 %v211_v45, %s753_s27 }
 0x143   : > { %269 = vrot.lane.b32.xlu1 %v212_v47, %s753_s27 }
 0x195   : > { %v223_v48 = vpop.permute.xlu0 %222 }
 0x196   : > { %v246_v59 = vsel %vm213_vm1, %v223_v48, 0.0 }
 0x199   : > { %v225_v49 = vpop.permute.xlu1 %224  ;;  %v227_v50 = vpop.permute.xlu0 %226 }
 0x19a   : > { %v247_v5 = vsel %vm213_vm1, %v225_v49, 0.0  ;;  %v248_v8 = vsel %vm213_vm1, %v227_v50, 0.0 }
 0x19d   : > { %v229_v52 = vpop.permute.xlu1 %228  ;;  %v231_v53 = vpop.permute.xlu0 %230 }
 0x19e   : > { %v249_v21 = vsel %vm213_vm1, %v229_v52, 0.0  ;;  %v250_v33 = vsel %vm213_vm1, %v231_v53, 0.0 }
 0x1a1   : > { %v233_v55 = vpop.permute.xlu1 %232  ;;  %v955_v56 = vpop.permute.xlu0 %234 }
 0x1a2   : > { %v251_v34 = vsel %vm213_vm1, %v233_v55, 0.0 }
 0x1a5   : > { %v959_v57 = vpop.permute.xlu1 %236  ;;  %v256_v58 = vpop.permute.xlu0 %255 }
 0x1a6   : > { %v279_v60 = vsel %vm254_vm2, %v256_v58, 0.0 }
 0x1a7   : > { %v287_v61 = vadd.f32 %v279_v60, %v246_v59 }
 0x1a9   : > { %v295_v0 = vmul.f32 0.25, %v287_v61  ;;  %v258_v1 = vpop.permute.xlu1 %257  ;;  %v260_v2 = vpop.permute.xlu0 %259 }
 0x1aa   : > { %v280_v9 = vsel %vm254_vm2, %v258_v1, 0.0  ;;  %v281_v12 = vsel %vm254_vm2, %v260_v2, 0.0 }
 0x1ab   : > { %v288_v16 = vadd.f32 %v280_v9, %v247_v5  ;;  %v289_v17 = vadd.f32 %v281_v12, %v248_v8  ;;  %v303_v3 = vadd.f32 %v295_v0, %v154_v63 }
 0x1ad   : > { %v296_v19 = vmul.f32 0.25, %v288_v16  ;;  %v262_v20 = vpop.permute.xlu1 %261  ;;  %v297_v23 = vmul.f32 0.25, %v289_v17  ;;  %v264_v6 = vpop.permute.xlu0 %263  ;;  %v322_v27 = vrot.slane %v303_v3, 7  ;;  %v349_v30 = vrot.slane %v303_v3, 1 }
 0x1ae   : > { %v282_v24 = vsel %vm254_vm2, %v262_v20, 0.0  ;;  %v283_v36 = vsel %vm254_vm2, %v264_v6, 0.0  ;;  %v311_v39 = vmul.f32 0.5, %v303_v3  ;;  %v252_v17 = vsel %vm213_vm1, %v955_v56, 0.0 }
 0x1af   : > { %v304_v25 = vadd.f32 %v296_v19, %v155_v13  ;;  %v290_v26 = vadd.f32 %v282_v24, %v249_v21  ;;  %v305_v35 = vadd.f32 %v297_v23, %v156_v22  ;;  %v291_v48 = vadd.f32 %v283_v36, %v250_v33 }
 0x1b0   : > { %v159_v20 = vmul.f32 0.5, %v899_v11  ;;  %v160_v11 = vmul.f32 0.5, %v905_v14  ;;  %v161_v36 = vmul.f32 0.5, %v907_v15 }
 0x1b1   : > { %v326_v4 = vrot.slane %v304_v25, 7  ;;  %v353_v31 = vrot.slane %v304_v25, 1  ;;  %v298_v32 = vmul.f32 0.25, %v290_v26  ;;  %v266_v43 = vpop.permute.xlu1 %265  ;;  %v268_v44 = vpop.permute.xlu0 %267  ;;  %v312_v45 = vmul.f32 0.5, %v304_v25 }
 0x1b2   : > { %v323_v49 = vrot.slane %v305_v35, 7  ;;  %v350_v50 = vrot.slane %v305_v35, 1  ;;  %v284_v58 = vsel %vm254_vm2, %v266_v43, 0.0  ;;  %v285_v59 = vsel %vm254_vm2, %v268_v44, 0.0 }
 0x1b3   : > { %v331_v37 = vsel %vm330_vm3, %v322_v27, %v326_v4  ;;  %v335_v7 = vsel %vm330_vm3, %v326_v4, %v322_v27  ;;  %v358_v10 = vsel %vm357_vm5, %v349_v30, %v353_v31  ;;  %v362_v38 = vsel %vm357_vm5, %v353_v31, %v349_v30 }
 0x1b4   : > { %v341_v40 = vsel %vm339_vm4, %v335_v7, 0.0  ;;  %v369_v41 = vsel %vm367_vm6, %v362_v38, 0.0  ;;  %v306_v42 = vadd.f32 %v298_v32, %v157_v28  ;;  %v299_v13 = vmul.f32 0.25, %v291_v48 }
 0x1b5   : > { %v376_v46 = vadd.f32 %v358_v10, %v341_v40  ;;  %v377_v47 = vadd.f32 %v369_v41, %v331_v37  ;;  %v292_v16 = vadd.f32 %v284_v58, %v251_v34  ;;  %v293_v24 = vadd.f32 %v285_v59, %v252_v17  ;;  %v270_v6 = vpop.permute.xlu1 %269 }
 0x1b6   : > { %v327_v51 = vrot.slane %v306_v42, 7  ;;  %v354_v52 = vrot.slane %v306_v42, 1  ;;  %v313_v25 = vmul.f32 0.5, %v305_v35  ;;  %v314_v26 = vmul.f32 0.5, %v306_v42 }
 0x1b7   : > { %v384_v53 = vmul.f32 0.25, %v376_v46  ;;  %v385_v55 = vmul.f32 0.25, %v377_v47  ;;  %v300_v23 = vmul.f32 0.25, %v292_v16  ;;  %v307_v27 = vadd.f32 %v299_v13, %v158_v29 }
 0x1b8   : > { %v332_v60 = vsel %vm330_vm3, %v323_v49, %v327_v51  ;;  %v336_v61 = vsel %vm330_vm3, %v327_v51, %v323_v49  ;;  %v359_v63 = vsel %vm357_vm5, %v350_v50, %v354_v52  ;;  %v363_v0 = vsel %vm357_vm5, %v354_v52, %v350_v50 }
 0x1b9   : > { %v392_v1 = vadd.f32 %v384_v53, %v311_v39  ;;  %v393_v2 = vadd.f32 %v385_v55, %v312_v45  ;;  %v343_v5 = vsel %vm339_vm4, %v336_v61, 0.0  ;;  %v371_v8 = vsel %vm367_vm6, %v363_v0, 0.0 }
 0x1ba   : > { %v378_v9 = vadd.f32 %v359_v63, %v343_v5  ;;  %v379_v12 = vadd.f32 %v371_v8, %v332_v60  ;;  %v308_v30 = vadd.f32 %v300_v23, %v159_v20  ;;  %v286_v4 = vsel %vm254_vm2, %v270_v6, 0.0 }
 0x1bb   : > { %v1028_v3 = vadd.f32 1e-12, %v392_v1  ;;  %v1030_v19 = vadd.f32 1e-12, %v393_v2  ;;  %v301_v31 = vmul.f32 0.25, %v293_v24  ;;  %v253_v32 = vsel %vm213_vm1, %v959_v57, 0.0 }
 0x1bc   : > { %v386_v21 = vmul.f32 0.25, %v378_v9  ;;  %v387_v22 = vmul.f32 0.25, %v379_v12  ;;  %v328_v35 = vrot.slane %v308_v30, 7  ;;  %v355_v29 = vrot.slane %v308_v30, 1 }
 0x1bd   : > { %634 = vrsqrt.f32 %v1028_v3  ;;  %v294_v37 = vadd.f32 %v286_v4, %v253_v32  ;;  %v315_v7 = vmul.f32 0.5, %v307_v27  ;;  %v324_v10 = vrot.slane %v307_v27, 7 }
 0x1be   : > { %636 = vrsqrt.f32 %v1030_v19  ;;  %v394_v28 = vadd.f32 %v386_v21, %v313_v25  ;;  %v395_v56 = vadd.f32 %v387_v22, %v314_v26  ;;  %v351_v14 = vrot.slane %v307_v27, 1 }
 0x1bf   : > { %vm410_vm8 = vcmp.eq.f32.partialorder %v1028_v3, inf  ;;  %vm412_vm9 = vcmp.eq.f32.partialorder %v1028_v3, 0.0  ;;  %v309_v54 = vadd.f32 %v301_v31, %v160_v11  ;;  %v333_v57 = vsel %vm330_vm3, %v324_v10, %v328_v35 }
 0x1c0   : > { %v1041_v33 = vadd.f32 1e-12, %v394_v28  ;;  %v1043_v34 = vadd.f32 1e-12, %v395_v56  ;;  %v337_v38 = vsel %vm330_vm3, %v328_v35, %v324_v10  ;;  %v360_v15 = vsel %vm357_vm5, %v351_v14, %v355_v29 }
 0x1c1   : > { %v364_v39 = vsel %vm357_vm5, %v355_v29, %v351_v14  ;;  %v413_v40 = vand.u32 2147483648, %v1028_v3  ;;  %v345_v41 = vsel %vm339_vm4, %v337_v38, 0.0  ;;  %v302_v43 = vmul.f32 0.25, %v294_v37 }
 0x1c2   : > { %638 = vrsqrt.f32 %v1041_v33  ;;  %v373_v42 = vsel %vm367_vm6, %v364_v39, 0.0  ;;  %vm417_vm10 = vcmp.eq.f32.partialorder %v1030_v19, inf  ;;  %vm419_vm11 = vcmp.eq.f32.partialorder %v1030_v19, 0.0 }
 0x1c3   : > { %640 = vrsqrt.f32 %v1043_v34  ;;  %v380_v45 = vadd.f32 %v360_v15, %v345_v41  ;;  %v381_v46 = vadd.f32 %v373_v42, %v333_v57  ;;  %v420_v49 = vand.u32 2147483648, %v1030_v19 }
 0x1c4   : > { %v316_v50 = vmul.f32 0.5, %v308_v30  ;;  %v310_v51 = vadd.f32 %v302_v43, %v161_v36  ;;  %v325_v58 = vrot.slane %v309_v54, 7  ;;  %v352_v60 = vrot.slane %v309_v54, 1 }
 0x1c5   : > { %v388_v53 = vmul.f32 0.25, %v380_v45  ;;  %v389_v55 = vmul.f32 0.25, %v381_v46  ;;  %vm424_vm12 = vcmp.eq.f32.partialorder %v1041_v33, inf  ;;  %vm426_vm13 = vcmp.eq.f32.partialorder %v1041_v33, 0.0 }
 0x1c6   : > { %v329_v61 = vrot.slane %v310_v51, 7  ;;  %v356_v63 = vrot.slane %v310_v51, 1  ;;  %v427_v22 = vand.u32 2147483648, %v1041_v33  ;;  %vm431_vm14 = vcmp.eq.f32.partialorder %v1043_v34, inf }
 0x1c7   : > { %v635_v44 = vpop.eup %634  ;;  %v396_v2 = vadd.f32 %v388_v53, %v315_v7  ;;  %v397_v5 = vadd.f32 %v389_v55, %v316_v50  ;;  %v434_v27 = vand.u32 2147483648, %v1043_v34  ;;  %vm433_vm15 = vcmp.eq.f32.partialorder %v1043_v34, 0.0 }
 0x1c8   : > { %v637_v47 = vpop.eup %636  ;;  %v409_v48 = vmul.f32 %v635_v44, %v1028_v3  ;;  %v338_v9 = vsel %vm330_vm3, %v329_v61, %v325_v58  ;;  %v361_v12 = vsel %vm357_vm5, %v352_v60, %v356_v63  ;;  %v334_v6 = vsel %vm330_vm3, %v325_v58, %v329_v61 }
 0x1c9   : > { %v416_v52 = vmul.f32 %v637_v47, %v1030_v19  ;;  %v404_v16 = vadd.f32 1e-12, %v396_v2  ;;  %v405_v17 = vadd.f32 1e-12, %v397_v5  ;;  %v317_v62 = vmul.f32 0.5, %v309_v54 }
 0x1ca   : > { %v411_v59 = vsel %vm410_vm8, %v1028_v3, %v409_v48  ;;  %v347_v3 = vsel %vm339_vm4, %v338_v9, 0.0  ;;  %v318_v11 = vmul.f32 0.5, %v310_v51 }
 0x1cb   : > { %v414_v0 = vsel %vm412_vm9, %v413_v40, %v411_v59  ;;  %v418_v1 = vsel %vm417_vm10, %v1030_v19, %v416_v52  ;;  %v365_v19 = vsel %vm357_vm5, %v356_v63, %v352_v60  ;;  %v382_v23 = vadd.f32 %v361_v12, %v347_v3 }
 0x1cc   : > { %v421_v8 = vsel %vm419_vm11, %v420_v49, %v418_v1  ;;  %465 = vst.msk [vmem:[%s1080_s28] sm:$0xff] %vm464_vm7, %v414_v0  ;;  %v639_v13 = vpop.eup %638  ;;  %642 = vrsqrt.f32 %v404_v16  ;;  %v375_v25 = vsel %vm367_vm6, %v365_v19, 0.0  ;;  %vm438_vm0 = vcmp.eq.f32.partialorder %v404_v16, inf }
 0x1cd   : > { %466 = vst.msk [vmem:[%s1080_s28 + $0x8] sm:$0xff] %vm464_vm7, %v421_v8  ;;  %v641_v20 = vpop.eup %640  ;;  %v423_v21 = vmul.f32 %v639_v13, %v1041_v33  ;;  %644 = vrsqrt.f32 %v405_v17  ;;  %v383_v18 = vadd.f32 %v375_v25, %v334_v6  ;;  %v390_v4 = vmul.f32 0.25, %v382_v23 }
 0x1ce   : > { %v430_v24 = vmul.f32 %v641_v20, %v1043_v34  ;;  %v441_v7 = vand.u32 2147483648, %v404_v16  ;;  %vm440_vm1 = vcmp.eq.f32.partialorder %v404_v16, 0.0  ;;  %vm445_vm2 = vcmp.eq.f32.partialorder %v405_v17, inf }
 0x1cf   : > { %v425_v26 = vsel %vm424_vm12, %v1041_v33, %v423_v21  ;;  %v391_v31 = vmul.f32 0.25, %v383_v18  ;;  %v398_v32 = vadd.f32 %v390_v4, %v317_v62  ;;  %v448_v54 = vand.u32 2147483648, %v405_v17 }
 0x1d0   : > { %v428_v28 = vsel %vm426_vm13, %v427_v22, %v425_v26  ;;  %v432_v56 = vsel %vm431_vm14, %v1043_v34, %v430_v24  ;;  %vm447_vm3 = vcmp.eq.f32.partialorder %v405_v17, 0.0 }
 0x1d1   : > { %v435_v30 = vsel %vm433_vm15, %v434_v27, %v432_v56  ;;  %467 = vst.msk [vmem:[%s1080_s28 + $0x10] sm:$0xff] %vm464_vm7, %v428_v28  ;;  %v399_v33 = vadd.f32 %v391_v31, %v318_v11  ;;  %v406_v35 = vadd.f32 1e-12, %v398_v32 }
 0x1d2   : > { %468 = vst.msk [vmem:[%s1080_s28 + $0x18] sm:$0xff] %vm464_vm7, %v435_v30 }
 0x1d3   : > { %v407_v29 = vadd.f32 1e-12, %v399_v33  ;;  %646 = vrsqrt.f32 %v406_v35  ;;  %vm452_vm4 = vcmp.eq.f32.partialorder %v406_v35, inf  ;;  %v455_v42 = vand.u32 2147483648, %v406_v35 }
 0x1d4   : > { %vm454_vm5 = vcmp.eq.f32.partialorder %v406_v35, 0.0 }
 0x1d5   : > { %648 = vrsqrt.f32 %v407_v29  ;;  %vm459_vm6 = vcmp.eq.f32.partialorder %v407_v29, inf  ;;  %v462_v46 = vand.u32 2147483648, %v407_v29  ;;  %vm461_vm8 = vcmp.eq.f32.partialorder %v407_v29, 0.0 }
 0x1d6   : > { %v643_v36 = vpop.eup %642 }
 0x1d7   : > { %v645_v37 = vpop.eup %644  ;;  %v437_v34 = vmul.f32 %v643_v36, %v404_v16 }
 0x1d8   : > { %v444_v10 = vmul.f32 %v645_v37, %v405_v17 }
 0x1d9   : > { %v439_v14 = vsel %vm438_vm0, %v404_v16, %v437_v34 }
 0x1da   : > { %v442_v57 = vsel %vm440_vm1, %v441_v7, %v439_v14  ;;  %v446_v38 = vsel %vm445_vm2, %v405_v17, %v444_v10 }
 0x1db   : > { %v449_v15 = vsel %vm447_vm3, %v448_v54, %v446_v38  ;;  %469 = vst.msk [vmem:[%s1080_s28 + $0x20] sm:$0xff] %vm464_vm7, %v442_v57 }
 0x1dc   : > { %470 = vst.msk [vmem:[%s1080_s28 + $0x28] sm:$0xff] %vm464_vm7, %v449_v15 }
 0x1dd   : > { %v647_v39 = vpop.eup %646 }
 0x1de   : > { %v451_v40 = vmul.f32 %v647_v39, %v406_v35 }
 0x1df   : > { %v649_v41 = vpop.eup %648 }
 0x1e0   : > { %v453_v43 = vsel %vm452_vm4, %v406_v35, %v451_v40  ;;  %v458_v44 = vmul.f32 %v649_v41, %v407_v29 }
 0x1e1   : > { %v456_v45 = vsel %vm454_vm5, %v455_v42, %v453_v43 }
 0x1e2   : > { %v460_v47 = vsel %vm459_vm6, %v407_v29, %v458_v44  ;;  %471 = vst.msk [vmem:[%s1080_s28 + $0x30] sm:$0xff] %vm464_vm7, %v456_v45 }
 0x1e3   : > { %v463_v48 = vsel %vm461_vm8, %v462_v46, %v460_v47 }
 0x1e4   : > { %472 = vst.msk [vmem:[%s1080_s28 + $0x38] sm:$0xff] %vm464_vm7, %v463_v48 }
 0x1e5   : > { %693 = shalt.err (!%p690_p2)
}
 0x1e6   : > { %s694_s20 = scalar_lea.hbm %s1123_s5, 1024  ;;  %s698_s24 = scalar_lea.hbm %s1174_s1, 2048 }
 0x1e7   : > { %p695_p4 = scmp.ne.s32.totalorder %s1123_s5, %s694_s20  ;;  %p699_p9 = scmp.lt.u32.totalorder %s1123_s5, %s1174_s1 }
 0x1e8   : > { %p700_p1 = scmp.lt.u32.totalorder %s698_s24, %s694_s20  ;;  %p702_p6 = scmp.lt.u32.totalorder %s694_s20, %s1123_s5 }
 0x1e9   : > { %p696_p5 = pnand %p695_p4, %p1181_p11 }
 0x1ea   : > { %p701_p3 = por %p700_p1, %p699_p9 }
 0x1eb   : > { %p697_p7 = pneg %p696_p5 }
 0x1ec   : > { %p703_p12 = por %p702_p6, %p701_p3 }
 0x1ee   : > { %p704_p13 = pnand %p703_p12, %p697_p7 }
 0x1f0   : > { %707 = shalt.err (!%p704_p13)
}
 0x1f1   : > { %s755_s25 = smov 128   ;;  %s756_s17 = smov 8  }
 0x1f2   : > { %583 = dma.vmem_to_hbm [thread:$0]  (%p1181_p11), %s1125_s2, 1024, %s1123_s5, %s474_s10, %s755_s25, %s755_s25, %s756_s17  }
 0x1f3 PF: > { %s503_s27 = sand.u32 1, %s734_s6   ;;  %p1182_p8 = scmp.ne.s32.totalorder %s1179_s19, 0 }
 0x1f4   : > { %p1183_p10 = scmp.ge.s32.totalorder %s746_s9, 2  ;;  %s504_s28 = scalar_lea.sflag [#allocation4], %s503_s27 }
 0x1f6   : > { %p590_p0 = pnand %p1183_p10, %p1182_p8 }
 0x1f8   : > { %729 = dma.done.wait (!%p590_p0), %s504_s28, 1024  }
 0x1f9   : > { %731 = vsyncadd (!%p590_p0), %s504_s28, 4294966272  ;;  %p14_p2 = scmp.ge.s32.totalorder %s792_s12, 4   ;;  %s1184_s6 = smov %s738_s7 }
 0x1fa   : > { %s1185_s7 = smov %s742_s8  ;;  %s1186_s8 = smov %s804_s15 }
 0x1fb   : > { %s1187_s9 = smov %s792_s12  ;;  %16 = sbr.rel (!%p14_p2) target bundleno = 5 (0x5), region = 69 }
 0x202   :  { %509 = vsyncpa [#allocation3], 1 }
 0x203   :  { %511 = vsyncpa [#allocation3 + $0x1], 1 }
 0x204   :  { %512 = vsyncpa [#allocation4], 1 }
 0x205   :  { %514 = vsyncpa [#allocation4 + $0x1], 1 }

</bundles_post_ra>
